<compile_context>
chip_gen: v6e
topology: v6e:2x2x1
jax: 0.10.0
libtpu: 0.0.40
codegen_flags: <defaults>
</compile_context>

<pallas_src>
import functools

import jax
import jax.numpy as jnp
from jax.experimental import pallas as pl
from jax.experimental.pallas import tpu as pltpu

LANES = 128  # lane-dense logits width (real logits live in columns 0..1)


def _round_up(x: int, m: int) -> int:
    return ((x + m - 1) // m) * m


# ---------------------------------------------------------------------------
# Shared classify-head math (operates on f32 (tb, D) tiles already in VMEM/vregs)
# ---------------------------------------------------------------------------
def _head_compute(nl, plh, w1_ref, b1_ref, w2_ref, b2_ref, *, concat_matmul):
    """[nl*pl, |nl-pl|, nl, pl] @ W1 -> sigmoid -> @ W2; returns (tb, LANES) f32."""
    mm_dtype = w1_ref.dtype          # bf16 when hidden states are bf16, else f32
    mul = nl * plh                   # f32 elementwise (VPU)
    diff = jnp.abs(nl - plh)
    if concat_matmul:
        # D % 128 == 0: tile-aligned lane concat + one K=4D MXU push.
        fuse = jnp.concatenate(
            [mul.astype(mm_dtype), diff.astype(mm_dtype),
             nl.astype(mm_dtype), plh.astype(mm_dtype)], axis=-1)
        h = jnp.dot(fuse, w1_ref[...], preferred_element_type=jnp.float32)
    else:
        # D < 128: four partial K=D matmuls against W1 reshaped to (4, D, H2)
        # (avoids a sub-tile lane concat inside the kernel).
        h = jnp.dot(mul.astype(mm_dtype), w1_ref[0], preferred_element_type=jnp.float32)
        h += jnp.dot(diff.astype(mm_dtype), w1_ref[1], preferred_element_type=jnp.float32)
        h += jnp.dot(nl.astype(mm_dtype), w1_ref[2], preferred_element_type=jnp.float32)
        h += jnp.dot(plh.astype(mm_dtype), w1_ref[3], preferred_element_type=jnp.float32)
    h += b1_ref[...].astype(jnp.float32)
    act = jax.nn.sigmoid(h)          # EUP; nn.Dropout(0.2) is identity at inference
    logits = jnp.dot(act.astype(w2_ref.dtype), w2_ref[...],
                     preferred_element_type=jnp.float32)
    logits += b2_ref[...].astype(jnp.float32)
    return logits                    # (tb, LANES): cols 0..1 real, 2.. exact zeros


# ---------------------------------------------------------------------------
# Fused kernel: mean-pool (B, S, D) x2 over S  +  classifyHeader -> (B, 128) logits
# ---------------------------------------------------------------------------
def _fused_kernel(nl_hs_ref, pl_hs_ref, w1_ref, b1_ref, w2_ref, b2_ref, o_ref,
                  acc_nl, acc_pl, *, inv_seq_len, concat_matmul):
    s = pl.program_id(1)

    @pl.when(s == 0)
    def _():
        acc_nl[...] = jnp.zeros_like(acc_nl)
        acc_pl[...] = jnp.zeros_like(acc_pl)

    # f32 accumulation of the sequence sum (bf16-safe). The cross-sublane sum lands
    # on the XLU slot while the kernel stays HBM/DMA-bound, so it is effectively free.
    acc_nl[...] += jnp.sum(nl_hs_ref[...].astype(jnp.float32), axis=1)
    acc_pl[...] += jnp.sum(pl_hs_ref[...].astype(jnp.float32), axis=1)

    @pl.when(s == pl.num_programs(1) - 1)
    def _():
        nl = acc_nl[...] * inv_seq_len           # pooled (tb, D) — never leaves VMEM
        plh = acc_pl[...] * inv_seq_len
        logits = _head_compute(nl, plh, w1_ref, b1_ref, w2_ref, b2_ref,
                               concat_matmul=concat_matmul)
        o_ref[...] = logits.astype(o_ref.dtype)  # lane-dense (tb, 128) store


def rnn_tracer_from_hidden_states(hs_nl, hs_pl, w1, b1, w2, b2,
                                  *, target_block_bytes: int = 3 * 1024 * 1024):
    """Fused RNNTracer pipeline: mean-pool both encoders' (B,S,D) states + head."""
    assert hs_nl.shape == hs_pl.shape
    B, S, D = hs_nl.shape
    H2 = w1.shape[1]
    assert w1.shape == (4 * D, H2) and w2.shape == (H2, 2)
    assert b1.shape == (H2,) and b2.shape == (2,)

    in_dtype = hs_nl.dtype
    itemsize = jnp.dtype(in_dtype).itemsize
    sub = max(8, 32 // itemsize)                 # sublane packing of the seq axis

    # Batch tile = head-matmul M dim; up to 256 rows (v6e/v7x MXU are 256 wide).
    tb = min(_round_up(B, 8), 256)
    # Seq tile sized so one pipelined input buffer ~ target_block_bytes.
    # 2 inputs x 2 buffers x 3 MiB = 12 MiB fits every generation's scoped-VMEM default.
    max_ts = max(sub, (target_block_bytes // max(1, tb * D * itemsize)) // sub * sub)
    ts = min(_round_up(S, sub), max_ts)

    b_pad = _round_up(B, tb)
    s_pad = _round_up(S, ts)
    if b_pad != B or s_pad != S:
        pad = ((0, b_pad - B), (0, s_pad - S), (0, 0))
        hs_nl = jnp.pad(hs_nl, pad)              # zero pad is exact: divisor is true S
        hs_pl = jnp.pad(hs_pl, pad)

    # bf16 MXU path: weights follow the hidden-state dtype (f32 inputs stay f32).
    mm_dtype = jnp.bfloat16 if in_dtype == jnp.bfloat16 else w1.dtype
    concat_matmul = (D % 128 == 0)
    w1_k = (w1 if concat_matmul else w1.reshape(4, D, H2)).astype(mm_dtype)
    b1_k = b1.reshape(1, H2).astype(jnp.float32)
    # Lane-dense output: pad W2/b2 to 128 columns (extra cols are exact zeros).
    w2_k = jnp.pad(w2, ((0, 0), (0, LANES - 2))).astype(mm_dtype)
    b2_k = jnp.pad(b2.reshape(1, 2), ((0, 0), (0, LANES - 2))).astype(jnp.float32)

    w1_spec = (pl.BlockSpec((4 * D, H2), lambda b, s: (0, 0)) if concat_matmul
               else pl.BlockSpec((4, D, H2), lambda b, s: (0, 0, 0)))

    grid = (b_pad // tb, s_pad // ts)            # reduction (seq) axis last
    # NOTE(v7x): with tiny B there is a single "parallel" batch block so one of the
    # two TensorCores idles; total work is microscopic here so it is not worth a
    # cross-block D split of the head matmul.
    out = pl.pallas_call(
        functools.partial(_fused_kernel, inv_seq_len=1.0 / S,
                          concat_matmul=concat_matmul),
        out_shape=jax.ShapeDtypeStruct((b_pad, LANES), jnp.float32),
        grid_spec=pltpu.PrefetchScalarGridSpec(
            num_scalar_prefetch=0,
            grid=grid,
            in_specs=[
                pl.BlockSpec((tb, ts, D), lambda b, s: (b, s, 0)),   # nl hidden states
                pl.BlockSpec((tb, ts, D), lambda b, s: (b, s, 0)),   # pl hidden states
                w1_spec,                                             # W1 (resident)
                pl.BlockSpec((1, H2), lambda b, s: (0, 0)),          # b1
                pl.BlockSpec((H2, LANES), lambda b, s: (0, 0)),      # W2 (lane-padded)
                pl.BlockSpec((1, LANES), lambda b, s: (0, 0)),       # b2 (lane-padded)
            ],
            out_specs=pl.BlockSpec((tb, LANES), lambda b, s: (b, 0)),
            scratch_shapes=[pltpu.VMEM((tb, D), jnp.float32),
                            pltpu.VMEM((tb, D), jnp.float32)],
        ),
        compiler_params=pltpu.CompilerParams(
            dimension_semantics=("parallel", "arbitrary")),
    )(hs_nl, hs_pl, w1_k, b1_k, w2_k, b2_k)
    return out[:B, :2]


# ---------------------------------------------------------------------------
# Standalone classify head (== RNNTracer.forward on already-encoded hiddens)
# ---------------------------------------------------------------------------
def _head_kernel(nl_ref, pl_ref, w1_ref, b1_ref, w2_ref, b2_ref, o_ref,
                 *, concat_matmul):
    nl = nl_ref[...].astype(jnp.float32)
    plh = pl_ref[...].astype(jnp.float32)
    logits = _head_compute(nl, plh, w1_ref, b1_ref, w2_ref, b2_ref,
                           concat_matmul=concat_matmul)
    o_ref[...] = logits.astype(o_ref.dtype)


def rnn_tracer_forward(nl_hidden, pl_hidden, w1, b1, w2, b2):
    """RNNTracer.forward / classifyHeader: (B, D), (B, D) -> logits (B, 2)."""
    B, D = nl_hidden.shape
    H2 = w1.shape[1]
    assert w1.shape == (4 * D, H2) and w2.shape == (H2, 2)

    tb = min(_round_up(B, 8), 256)
    b_pad = _round_up(B, tb)
    nl, plh = nl_hidden, pl_hidden
    if b_pad != B:
        nl = jnp.pad(nl, ((0, b_pad - B), (0, 0)))
        plh = jnp.pad(plh, ((0, b_pad - B), (0, 0)))

    mm_dtype = jnp.bfloat16 if nl_hidden.dtype == jnp.bfloat16 else w1.dtype
    concat_matmul = (D % 128 == 0)
    w1_k = (w1 if concat_matmul else w1.reshape(4, D, H2)).astype(mm_dtype)
    b1_k = b1.reshape(1, H2).astype(jnp.float32)
    w2_k = jnp.pad(w2, ((0, 0), (0, LANES - 2))).astype(mm_dtype)
    b2_k = jnp.pad(b2.reshape(1, 2), ((0, 0), (0, LANES - 2))).astype(jnp.float32)

    w1_spec = (pl.BlockSpec((4 * D, H2), lambda b: (0, 0)) if concat_matmul
               else pl.BlockSpec((4, D, H2), lambda b: (0, 0, 0)))

    out = pl.pallas_call(
        functools.partial(_head_kernel, concat_matmul=concat_matmul),
        out_shape=jax.ShapeDtypeStruct((b_pad, LANES), jnp.float32),
        grid_spec=pltpu.PrefetchScalarGridSpec(
            num_scalar_prefetch=0,
            grid=(b_pad // tb,),
            in_specs=[
                pl.BlockSpec((tb, D), lambda b: (b, 0)),
                pl.BlockSpec((tb, D), lambda b: (b, 0)),
                w1_spec,
                pl.BlockSpec((1, H2), lambda b: (0, 0)),
                pl.BlockSpec((H2, LANES), lambda b: (0, 0)),
                pl.BlockSpec((1, LANES), lambda b: (0, 0)),
            ],
            out_specs=pl.BlockSpec((tb, LANES), lambda b: (b, 0)),
        ),
        compiler_params=pltpu.CompilerParams(
            dimension_semantics=("parallel",)),
    )(nl, plh, w1_k, b1_k, w2_k, b2_k)
    return out[:B, :2]


# ---------------------------------------------------------------------------
# Pure-JAX references
# ---------------------------------------------------------------------------
def _classify_head_ref(nl, plh, w1, b1, w2, b2):
    nl = nl.astype(jnp.float32)
    plh = plh.astype(jnp.float32)
    fuse = jnp.concatenate([nl * plh, jnp.abs(nl - plh), nl, plh], axis=1)
    h = jax.nn.sigmoid(fuse @ w1 + b1)
    return h @ w2 + b2


def _fused_ref(hs_nl, hs_pl, w1, b1, w2, b2):
    nl = jnp.mean(hs_nl.astype(jnp.float32), axis=1)
    plh = jnp.mean(hs_pl.astype(jnp.float32), axis=1)
    return _classify_head_ref(nl, plh, w1, b1, w2, b2)


if __name__ == "__main__":
    # Shapes implied by RNNTracer(hidden_dim=32, rnn_type='bi_gru'):
    #   D = hidden_dim * 2 = 64,  W1 = (4D, 2D) = (256, 128),  W2 = (128, 2)
    B, S, hidden_dim = 2, 8, 32
    D = 2 * hidden_dim
    H2 = 2 * D

    key = jax.random.PRNGKey(0)
    k = jax.random.split(key, 12)
    hs_nl = jax.random.normal(k[0], (B, S, D), dtype=jnp.float32)
    hs_pl = jax.random.normal(k[1], (B, S, D), dtype=jnp.float32)
    w1 = 0.05 * jax.random.normal(k[2], (4 * D, H2), dtype=jnp.float32)
    b1 = 0.05 * jax.random.normal(k[3], (H2,), dtype=jnp.float32)
    w2 = 0.05 * jax.random.normal(k[4], (H2, 2), dtype=jnp.float32)
    b2 = 0.05 * jax.random.normal(k[5], (2,), dtype=jnp.float32)

    # --- Fused kernel: pooling of both encoders' states + classify head, 1 launch ---
    logits = rnn_tracer_from_hidden_states(hs_nl, hs_pl, w1, b1, w2, b2)
    jax.block_until_ready(logits)
    ref = _fused_ref(hs_nl, hs_pl, w1, b1, w2, b2)
    assert logits.shape == (B, 2), logits.shape
    assert jnp.allclose(logits, ref, atol=1e-5, rtol=1e-5), "fused kernel mismatch"

    # --- Standalone classify head (exact RNNTracer.forward signature) ---
    nl_hidden = jnp.mean(hs_nl, axis=1)
    pl_hidden = jnp.mean(hs_pl, axis=1)
    logits2 = rnn_tracer_forward(nl_hidden, pl_hidden, w1, b1, w2, b2)
    jax.block_until_ready(logits2)
    ref2 = _classify_head_ref(nl_hidden, pl_hidden, w1, b1, w2, b2)
    assert logits2.shape == (B, 2), logits2.shape
    assert jnp.allclose(logits2, ref2, atol=1e-5, rtol=1e-5), "classify head mismatch"

    # --- bf16 inputs, non-divisible B/S, concat-matmul (D % 128 == 0) path ---
    B2, S2, D2 = 5, 37, 256
    H2b = 2 * D2
    hs_nl_b = jax.random.normal(k[6], (B2, S2, D2), dtype=jnp.float32).astype(jnp.bfloat16)
    hs_pl_b = jax.random.normal(k[7], (B2, S2, D2), dtype=jnp.float32).astype(jnp.bfloat16)
    w1_b = 0.05 * jax.random.normal(k[8], (4 * D2, H2b), dtype=jnp.float32)
    b1_b = 0.05 * jax.random.normal(k[9], (H2b,), dtype=jnp.float32)
    w2_b = 0.05 * jax.random.normal(k[10], (H2b, 2), dtype=jnp.float32)
    b2_b = 0.05 * jax.random.normal(k[11], (2,), dtype=jnp.float32)

    logits_b = rnn_tracer_from_hidden_states(hs_nl_b, hs_pl_b, w1_b, b1_b, w2_b, b2_b)
    jax.block_until_ready(logits_b)
    ref_b = _fused_ref(hs_nl_b, hs_pl_b, w1_b, b1_b, w2_b, b2_b)
    assert logits_b.shape == (B2, 2), logits_b.shape
    assert jnp.allclose(logits_b, ref_b, atol=2e-2, rtol=2e-2), "bf16 fused mismatch"

    print("KERNEL_OK")
</pallas_src>

<mosaic_0001>
module attributes {stable_mosaic.version = 11 : i64} {
  func.func @_fused_kernel(%arg0: i32, %arg1: i32, %arg2: memref<8x8x64xf32, #tpu.memory_space<vmem>>, %arg3: memref<8x8x64xf32, #tpu.memory_space<vmem>>, %arg4: memref<4x64x128xf32, #tpu.memory_space<vmem>>, %arg5: memref<1x128xf32, #tpu.memory_space<vmem>>, %arg6: memref<128x128xf32, #tpu.memory_space<vmem>>, %arg7: memref<1x128xf32, #tpu.memory_space<vmem>>, %arg8: memref<8x128xf32, #tpu.memory_space<vmem>>, %arg9: memref<8x64xf32, #tpu.memory_space<vmem>>, %arg10: memref<8x64xf32, #tpu.memory_space<vmem>>) attributes {dimension_semantics = [#tpu.dimension_semantics<parallel>, #tpu.dimension_semantics<arbitrary>], iteration_bounds = array<i64: 1, 1>, scalar_prefetch = 0 : i64, scratch_operands = 2 : i64, tpu.core_type = #tpu.core_type<tc>, window_params = [{transform_indices = @transform_0, window_bounds = array<i64: 8, 8, 64>}, {transform_indices = @transform_1, window_bounds = array<i64: 8, 8, 64>}, {pipeline_mode = #tpu.pipeline_mode<synchronous>, transform_indices = @transform_2, window_bounds = array<i64: 4, 64, 128>}, {pipeline_mode = #tpu.pipeline_mode<synchronous>, transform_indices = @transform_3, window_bounds = array<i64: 1, 128>}, {pipeline_mode = #tpu.pipeline_mode<synchronous>, transform_indices = @transform_4, window_bounds = array<i64: 128, 128>}, {pipeline_mode = #tpu.pipeline_mode<synchronous>, transform_indices = @transform_5, window_bounds = array<i64: 1, 128>}, {transform_indices = @transform_6, window_bounds = array<i64: 8, 128>}]} {
    %c0_i32 = arith.constant 0 : i32
    %0 = arith.cmpi eq, %arg1, %c0_i32 : i32
    %1 = arith.extui %0 : i1 to i32
    %c0_i32_0 = arith.constant 0 : i32
    %2 = arith.cmpi ne, %1, %c0_i32_0 : i32
    scf.if %2 {
      %cst_17 = arith.constant 0.000000e+00 : f32
      %16 = vector.broadcast %cst_17 : f32 to vector<8x64xf32>
      %c0_18 = arith.constant 0 : index
      %c0_19 = arith.constant 0 : index
      %17 = vector.load %arg9[%c0_18, %c0_19] : memref<8x64xf32, #tpu.memory_space<vmem>>, vector<8x64xf32>
      tpu.vector_store %arg9[%c0_18, %c0_19], %16 {strides = array<i32>} : memref<8x64xf32, #tpu.memory_space<vmem>>, vector<8x64xf32>,
      %cst_20 = arith.constant 0.000000e+00 : f32
      %18 = vector.broadcast %cst_20 : f32 to vector<8x64xf32>
      %c0_21 = arith.constant 0 : index
      %c0_22 = arith.constant 0 : index
      %19 = vector.load %arg10[%c0_21, %c0_22] : memref<8x64xf32, #tpu.memory_space<vmem>>, vector<8x64xf32>
      tpu.vector_store %arg10[%c0_21, %c0_22], %18 {strides = array<i32>} : memref<8x64xf32, #tpu.memory_space<vmem>>, vector<8x64xf32>,
    } else {
    }
    %c0 = arith.constant 0 : index
    %c0_1 = arith.constant 0 : index
    %3 = vector.load %arg9[%c0, %c0_1] : memref<8x64xf32, #tpu.memory_space<vmem>>, vector<8x64xf32>
    %c0_2 = arith.constant 0 : index
    %c0_3 = arith.constant 0 : index
    %c0_4 = arith.constant 0 : index
    %4 = vector.load %arg2[%c0_2, %c0_3, %c0_4] : memref<8x8x64xf32, #tpu.memory_space<vmem>>, vector<8x8x64xf32>
    %cst = arith.constant dense<0.000000e+00> : vector<8x64xf32>
    %5 = vector.multi_reduction <add>, %4, %cst [1] : vector<8x8x64xf32> to vector<8x64xf32>
    %6 = arith.addf %3, %5 : vector<8x64xf32>
    %c0_5 = arith.constant 0 : index
    %c0_6 = arith.constant 0 : index
    %7 = vector.load %arg9[%c0_5, %c0_6] : memref<8x64xf32, #tpu.memory_space<vmem>>, vector<8x64xf32>
    tpu.vector_store %arg9[%c0_5, %c0_6], %6 {strides = array<i32>} : memref<8x64xf32, #tpu.memory_space<vmem>>, vector<8x64xf32>,
    %c0_7 = arith.constant 0 : index
    %c0_8 = arith.constant 0 : index
    %8 = vector.load %arg10[%c0_7, %c0_8] : memref<8x64xf32, #tpu.memory_space<vmem>>, vector<8x64xf32>
    %c0_9 = arith.constant 0 : index
    %c0_10 = arith.constant 0 : index
    %c0_11 = arith.constant 0 : index
    %9 = vector.load %arg3[%c0_9, %c0_10, %c0_11] : memref<8x8x64xf32, #tpu.memory_space<vmem>>, vector<8x8x64xf32>
    %cst_12 = arith.constant dense<0.000000e+00> : vector<8x64xf32>
    %10 = vector.multi_reduction <add>, %9, %cst_12 [1] : vector<8x8x64xf32> to vector<8x64xf32>
    %11 = arith.addf %8, %10 : vector<8x64xf32>
    %c0_13 = arith.constant 0 : index
    %c0_14 = arith.constant 0 : index
    %12 = vector.load %arg10[%c0_13, %c0_14] : memref<8x64xf32, #tpu.memory_space<vmem>>, vector<8x64xf32>
    tpu.vector_store %arg10[%c0_13, %c0_14], %11 {strides = array<i32>} : memref<8x64xf32, #tpu.memory_space<vmem>>, vector<8x64xf32>,
    %c0_i32_15 = arith.constant 0 : i32
    %13 = arith.cmpi eq, %arg1, %c0_i32_15 : i32
    %14 = arith.extui %13 : i1 to i32
    %c0_i32_16 = arith.constant 0 : i32
    %15 = arith.cmpi ne, %14, %c0_i32_16 : i32
    scf.if %15 {
      %c0_17 = arith.constant 0 : index
      %c0_18 = arith.constant 0 : index
      %16 = vector.load %arg9[%c0_17, %c0_18] : memref<8x64xf32, #tpu.memory_space<vmem>>, vector<8x64xf32>
      %cst_19 = arith.constant 1.250000e-01 : f32
      %17 = vector.broadcast %cst_19 : f32 to vector<8x64xf32>
      %18 = arith.mulf %16, %17 : vector<8x64xf32>
      %c0_20 = arith.constant 0 : index
      %c0_21 = arith.constant 0 : index
      %19 = vector.load %arg10[%c0_20, %c0_21] : memref<8x64xf32, #tpu.memory_space<vmem>>, vector<8x64xf32>
      %cst_22 = arith.constant 1.250000e-01 : f32
      %20 = vector.broadcast %cst_22 : f32 to vector<8x64xf32>
      %21 = arith.mulf %19, %20 : vector<8x64xf32>
      %22 = arith.mulf %18, %21 : vector<8x64xf32>
      %23 = arith.subf %18, %21 : vector<8x64xf32>
      %24 = math.absf %23 : vector<8x64xf32>
      %c0_23 = arith.constant 0 : index
      %c0_24 = arith.constant 0 : index
      %c0_25 = arith.constant 0 : index
      %25 = vector.load %arg4[%c0_23, %c0_24, %c0_25] : memref<4x64x128xf32, #tpu.memory_space<vmem>>, vector<1x64x128xf32>
      %26 = vector.shape_cast %25 : vector<1x64x128xf32> to vector<64x128xf32>
      %cst_26 = arith.constant dense<0.000000e+00> : vector<8x128xf32>
      %27 = tpu.matmul %22, %26, %cst_26 {dimension_numbers = #tpu.dot_dimension_numbers<[1], [0], [0], [1], [0, 0, 1, 1], [], []>} : vector<8x64xf32>, vector<64x128xf32>, vector<8x128xf32> -> vector<8x128xf32>
      %c1 = arith.constant 1 : index
      %c0_27 = arith.constant 0 : index
      %c0_28 = arith.constant 0 : index
      %28 = vector.load %arg4[%c1, %c0_27, %c0_28] : memref<4x64x128xf32, #tpu.memory_space<vmem>>, vector<1x64x128xf32>
      %29 = vector.shape_cast %28 : vector<1x64x128xf32> to vector<64x128xf32>
      %cst_29 = arith.constant dense<0.000000e+00> : vector<8x128xf32>
      %30 = tpu.matmul %24, %29, %cst_29 {dimension_numbers = #tpu.dot_dimension_numbers<[1], [0], [0], [1], [0, 0, 1, 1], [], []>} : vector<8x64xf32>, vector<64x128xf32>, vector<8x128xf32> -> vector<8x128xf32>
      %31 = arith.addf %27, %30 : vector<8x128xf32>
      %c2 = arith.constant 2 : index
      %c0_30 = arith.constant 0 : index
      %c0_31 = arith.constant 0 : index
      %32 = vector.load %arg4[%c2, %c0_30, %c0_31] : memref<4x64x128xf32, #tpu.memory_space<vmem>>, vector<1x64x128xf32>
      %33 = vector.shape_cast %32 : vector<1x64x128xf32> to vector<64x128xf32>
      %cst_32 = arith.constant dense<0.000000e+00> : vector<8x128xf32>
      %34 = tpu.matmul %18, %33, %cst_32 {dimension_numbers = #tpu.dot_dimension_numbers<[1], [0], [0], [1], [0, 0, 1, 1], [], []>} : vector<8x64xf32>, vector<64x128xf32>, vector<8x128xf32> -> vector<8x128xf32>
      %35 = arith.addf %31, %34 : vector<8x128xf32>
      %c3 = arith.constant 3 : index
      %c0_33 = arith.constant 0 : index
      %c0_34 = arith.constant 0 : index
      %36 = vector.load %arg4[%c3, %c0_33, %c0_34] : memref<4x64x128xf32, #tpu.memory_space<vmem>>, vector<1x64x128xf32>
      %37 = vector.shape_cast %36 : vector<1x64x128xf32> to vector<64x128xf32>
      %cst_35 = arith.constant dense<0.000000e+00> : vector<8x128xf32>
      %38 = tpu.matmul %21, %37, %cst_35 {dimension_numbers = #tpu.dot_dimension_numbers<[1], [0], [0], [1], [0, 0, 1, 1], [], []>} : vector<8x64xf32>, vector<64x128xf32>, vector<8x128xf32> -> vector<8x128xf32>
      %39 = arith.addf %35, %38 : vector<8x128xf32>
      %c0_36 = arith.constant 0 : index
      %c0_37 = arith.constant 0 : index
      %40 = vector.load %arg5[%c0_36, %c0_37] : memref<1x128xf32, #tpu.memory_space<vmem>>, vector<1x128xf32>
      %41 = vector.broadcast %40 : vector<1x128xf32> to vector<8x128xf32>
      %42 = arith.addf %39, %41 : vector<8x128xf32>
      %43 = arith.negf %42 : vector<8x128xf32>
      %44 = math.exp %43 : vector<8x128xf32>
      %cst_38 = arith.constant 1.000000e+00 : f32
      %45 = vector.broadcast %cst_38 : f32 to vector<8x128xf32>
      %46 = arith.addf %45, %44 : vector<8x128xf32>
      %47 = arith.divf %45, %46 : vector<8x128xf32>
      %c0_39 = arith.constant 0 : index
      %c0_40 = arith.constant 0 : index
      %48 = vector.load %arg6[%c0_39, %c0_40] : memref<128x128xf32, #tpu.memory_space<vmem>>, vector<128x128xf32>
      %cst_41 = arith.constant dense<0.000000e+00> : vector<8x128xf32>
      %49 = tpu.matmul %47, %48, %cst_41 {dimension_numbers = #tpu.dot_dimension_numbers<[1], [0], [0], [1], [0, 0, 1, 1], [], []>} : vector<8x128xf32>, vector<128x128xf32>, vector<8x128xf32> -> vector<8x128xf32>
      %c0_42 = arith.constant 0 : index
      %c0_43 = arith.constant 0 : index
      %50 = vector.load %arg7[%c0_42, %c0_43] : memref<1x128xf32, #tpu.memory_space<vmem>>, vector<1x128xf32>
      %51 = vector.broadcast %50 : vector<1x128xf32> to vector<8x128xf32>
      %52 = arith.addf %49, %51 : vector<8x128xf32>
      %c0_44 = arith.constant 0 : index
      %c0_45 = arith.constant 0 : index
      %53 = vector.load %arg8[%c0_44, %c0_45] : memref<8x128xf32, #tpu.memory_space<vmem>>, vector<8x128xf32>
      tpu.vector_store %arg8[%c0_44, %c0_45], %52 {strides = array<i32>} : memref<8x128xf32, #tpu.memory_space<vmem>>, vector<8x128xf32>,
    } else {
    }
    return
  }
  func.func @transform_0(%arg0: i32, %arg1: i32) -> (i32, i32, i32) {
    %c0_i32 = arith.constant 0 : i32
    %c0_i32_0 = arith.constant 0 : i32
    return %arg0, %arg1, %c0_i32 : i32, i32, i32
  }
  func.func @transform_1(%arg0: i32, %arg1: i32) -> (i32, i32, i32) {
    %c0_i32 = arith.constant 0 : i32
    %c0_i32_0 = arith.constant 0 : i32
    return %arg0, %arg1, %c0_i32 : i32, i32, i32
  }
  func.func @transform_2(%arg0: i32, %arg1: i32) -> (i32, i32, i32) {
    %c0_i32 = arith.constant 0 : i32
    %c0_i32_0 = arith.constant 0 : i32
    %c0_i32_1 = arith.constant 0 : i32
    %c0_i32_2 = arith.constant 0 : i32
    return %c0_i32, %c0_i32_0, %c0_i32_1 : i32, i32, i32
  }
  func.func @transform_3(%arg0: i32, %arg1: i32) -> (i32, i32) {
    %c0_i32 = arith.constant 0 : i32
    %c0_i32_0 = arith.constant 0 : i32
    %c0_i32_1 = arith.constant 0 : i32
    return %c0_i32, %c0_i32_0 : i32, i32
  }
  func.func @transform_4(%arg0: i32, %arg1: i32) -> (i32, i32) {
    %c0_i32 = arith.constant 0 : i32
    %c0_i32_0 = arith.constant 0 : i32
    %c0_i32_1 = arith.constant 0 : i32
    return %c0_i32, %c0_i32_0 : i32, i32
  }
  func.func @transform_5(%arg0: i32, %arg1: i32) -> (i32, i32) {
    %c0_i32 = arith.constant 0 : i32
    %c0_i32_0 = arith.constant 0 : i32
    %c0_i32_1 = arith.constant 0 : i32
    return %c0_i32, %c0_i32_0 : i32, i32
  }
  func.func @transform_6(%arg0: i32, %arg1: i32) -> (i32, i32) {
    %c0_i32 = arith.constant 0 : i32
    %c0_i32_0 = arith.constant 0 : i32
    return %arg0, %c0_i32 : i32, i32
  }
}

</mosaic_0001>

<bundles_post_ra>
// kernel: tpu_custom_call.1
= control target key start
LH: loop header
LB: loop body
LE: loop exit
PB: predicated region body
PF: predicated region fallthrough
CT: control target
= control target key end

     0   :  { %11 = vsyncpa [#allocation5], 0  ;;  %s1191_s0 = inlined_call_operand.hbm [shape: f32[8,8,64], index: 0, kind: input, shape index: {}]   ;;  %s1192_s1 = inlined_call_operand.hbm [shape: f32[8,8,64], index: 1, kind: input, shape index: {}]   ;;  %s1193_s2 = inlined_call_operand.hbm [shape: f32[4,64,128], index: 2, kind: input, shape index: {}]   ;;  %s1194_s3 = inlined_call_operand.vmem [shape: f32[1,128], index: 3, kind: input, shape index: {}]   ;;  %s1195_s4 = inlined_call_operand.hbm [shape: f32[128,128], index: 4, kind: input, shape index: {}]   ;;  %s1196_s5 = inlined_call_operand.vmem [shape: f32[1,128], index: 5, kind: input, shape index: {}]   ;;  %s1197_s6 = inlined_call_operand.hbm [shape: f32[8,128], index: 6, kind: output, shape index: {}]  }
   0x1   :  { %12 = vsyncpa [#allocation8], 0 }
   0x2   :  { %13 = vsyncpa [#allocation11], 0 }
   0x3   :  { %14 = vsyncpa [#allocation6], 0  ;;  %s1016_s21 = smov [#allocation7]   ;;  %s1017_s23 = smov [#allocation4]  }
   0x4   :  { %s32_s22 = sshll.u32 %s1016_s21, 4  ;;  %s20_s24 = sshll.u32 %s1017_s23, 4  ;;  %s33_s22 = int_to_ptr.vmem [resolvable:$true] %s32_s22  ;;  %s21_s24 = int_to_ptr.vmem [resolvable:$true] %s20_s24 }
   0x5   :  { %s916_s25 = scalar_lea.vmem %s33_s22, 1024  ;;  %p921_p1 = scmp.lt.s32.totalorder %s33_s22, %s33_s22 }
   0x6   :  { %p917_p0 = scmp.ne.s32.totalorder %s33_s22, %s916_s25  ;;  %p922_p2 = scmp.lt.s32.totalorder %s916_s25, %s916_s25 }
   0x8   :  { %p923_p3 = por %p922_p2, %p921_p1 }
   0xa   :  { %p924_p4 = pnand %p923_p3, %p917_p0 }
   0xc   :  { %927 = shalt.err (!%p924_p4)
}
   0xd   :  { %s1018_s26 = smov 128   ;;  %s1019_s27 = smov 8  }
   0xe   :  { %38 = dma.hbm_to_vmem [thread:$0]  %s1192_s1, 1024, %s33_s22, [#allocation8], %s1018_s26, %s1018_s26, %s1019_s27  }
   0xf   :  { %s936_s30 = scalar_lea.vmem %s21_s24, 1024  ;;  %p941_p6 = scmp.lt.s32.totalorder %s21_s24, %s21_s24 }
  0x10   :  { %p937_p5 = scmp.ne.s32.totalorder %s21_s24, %s936_s30  ;;  %p942_p7 = scmp.lt.s32.totalorder %s936_s30, %s936_s30 }
  0x12   :  { %p943_p8 = por %p942_p7, %p941_p6 }
  0x14   :  { %p944_p9 = pnand %p943_p8, %p937_p5 }
  0x16   :  { %947 = shalt.err (!%p944_p9)
}
  0x17   :  { %26 = dma.hbm_to_vmem [thread:$0]  %s1191_s0, 1024, %s21_s24, [#allocation5], %s1018_s26, %s1018_s26, %s1019_s27  }
  0x18   :  { %s1020_s9 = smov [#allocation9]   ;;  %s1021_s11 = smov [#allocation10]  }
  0x19   :  { %s44_s10 = sshll.u32 %s1020_s9, 4  ;;  %s58_s12 = sshll.u32 %s1021_s11, 4  ;;  %s45_s10 = int_to_ptr.vmem [resolvable:$true] %s44_s10  ;;  %s59_s12 = int_to_ptr.vmem [resolvable:$true] %s58_s12 }
  0x1a   :  { %s956_s1 = scalar_lea.vmem %s45_s10, 4096  ;;  %p961_p11 = scmp.lt.s32.totalorder %s45_s10, %s45_s10 }
  0x1b   :  { %p957_p10 = scmp.ne.s32.totalorder %s45_s10, %s956_s1  ;;  %p962_p12 = scmp.lt.s32.totalorder %s956_s1, %s956_s1 }
  0x1d   :  { %p963_p13 = por %p962_p12, %p961_p11 }
  0x1f   :  { %p964_p0 = pnand %p963_p13, %p957_p10 }
  0x21   :  { %967 = shalt.err (!%p964_p0)
}
  0x22   :  { %50 = dma.hbm_to_vmem [thread:$0]  %s1193_s2, 4096, %s45_s10, [#allocation8], %s1018_s26, %s1018_s26, %s1019_s27  }
  0x23   :  { %s976_s0 = scalar_lea.vmem %s59_s12, 2048  ;;  %p981_p2 = scmp.lt.s32.totalorder %s59_s12, %s59_s12 }
  0x24   :  { %p977_p1 = scmp.ne.s32.totalorder %s59_s12, %s976_s0  ;;  %p982_p3 = scmp.lt.s32.totalorder %s976_s0, %s976_s0 }
  0x26   :  { %p983_p4 = por %p982_p3, %p981_p2 }
  0x28   :  { %p984_p5 = pnand %p983_p4, %p977_p1 }
  0x2a   :  { %987 = shalt.err (!%p984_p5)
}
  0x2b   :  { %64 = dma.hbm_to_vmem [thread:$0]  %s1195_s4, 2048, %s59_s12, [#allocation11], %s1018_s26, %s1018_s26, %s1019_s27  }
  0x2c   :  { %1008 = dma.done.wait [#allocation5], 1024  }
  0x2d   :  { %1009 = vsyncadd [#allocation5], 4294966272 }
  0x2e   :  { %1010 = dma.done.wait [#allocation8], 5120  }
  0x2f   :  { %1011 = vsyncadd [#allocation8], 4294962176 }
  0x30   :  { %1012 = dma.done.wait [#allocation11], 2048  }
  0x31   :  { %1013 = vsyncadd [#allocation11], 4294965248  ;;  %vm83_vm0 = vcmask 523264   ;;  %v1022_v0 = vmov 0.0   ;;  %vm1023_vm1 = vmmov 0   ;;  %v286_v1 = vld [vmem:[#allocation9 + $0x78] sm:$0xff] }
  0x32   :  { %784 = vmatprep.subr.mxu1 %v1022_v0  ;;  %800 = vmatprep.mubr.msk.f32.mxu1 %vm1023_vm1, %v1022_v0  ;;  %84 = vst.msk [vmem:[#allocation2] sm:$0xff] %vm83_vm0, %v1022_v0  ;;  %85 = vst.msk [vmem:[#allocation3] sm:$0xff] %vm83_vm0, %v1022_v0  ;;  %v285_v2 = vld [vmem:[#allocation9 + $0x70] sm:$0xff]  ;;  %v284_v3 = vld [vmem:[#allocation9 + $0x68] sm:$0xff]  ;;  %vm160_vm2 = vcmask 1041409   ;;  %vm162_vm3 = vcmask 1042434  }
  0x33   :  { %822 = vmatprep.subr.mxu0 %v1022_v0  ;;  %838 = vmatprep.mubr.msk.f32.mxu0 %vm1023_vm1, %v1022_v0  ;;  %v283_v4 = vld [vmem:[#allocation9 + $0x60] sm:$0xff]  ;;  %v88_v6 = vld [vmem:[#allocation4 + $0x8] sm:$0xff]  ;;  %v89_v7 = vld [vmem:[#allocation4 + $0x10] sm:$0xff]  ;;  %vm164_vm4 = vcmask 1043459   ;;  %vm166_vm5 = vcmask 1044484   ;;  %vm168_vm6 = vcmask 1045509  }
  0x34   :  { %785 = vmatpush3.msra.mxu1 %v286_v1  ;;  %v87_v5 = vld [vmem:[#allocation4] sm:$0xff]  ;;  %v90_v8 = vld [vmem:[#allocation4 + $0x18] sm:$0xff]  ;;  %v92_v10 = vld [vmem:[#allocation4 + $0x28] sm:$0xff]  ;;  %v103_v12 = vsel %vm83_vm0, %v88_v6, 0.0  ;;  %v110_v13 = vsel %vm83_vm0, %v89_v7, 0.0  ;;  %vm170_vm7 = vcmask 1046534  }
  0x35   :  { %786 = vmatprep.subr.mxu1 %v1022_v0  ;;  %v91_v9 = vld [vmem:[#allocation4 + $0x20] sm:$0xff]  ;;  %v96_v11 = vsel %vm83_vm0, %v87_v5, 0.0  ;;  %v93_v14 = vld [vmem:[#allocation4 + $0x30] sm:$0xff]  ;;  %v94_v15 = vld [vmem:[#allocation4 + $0x38] sm:$0xff]  ;;  %v104_v17 = vrot.slane %v103_v12, 4  ;;  %v111_v18 = vrot.slane %v110_v13, 4 }
  0x36   :  { %787 = vmatpush3.msra.mxu1 %v285_v2  ;;  %v97_v16 = vrot.slane %v96_v11, 4  ;;  %v117_v19 = vsel %vm83_vm0, %v90_v8, 0.0  ;;  %v282_v20 = vld [vmem:[#allocation9 + $0x58] sm:$0xff]  ;;  %v124_v22 = vsel %vm83_vm0, %v91_v9, 0.0  ;;  %v131_v23 = vsel %vm83_vm0, %v92_v10, 0.0  ;;  %v281_v29 = vld [vmem:[#allocation9 + $0x50] sm:$0xff] }
  0x37   :  { %788 = vmatprep.subr.mxu1 %v1022_v0  ;;  %v118_v21 = vrot.slane %v117_v19, 4  ;;  %v138_v24 = vsel %vm83_vm0, %v93_v14, 0.0  ;;  %v105_v26 = vadd.f32 %v104_v17, %v103_v12  ;;  %v112_v27 = vadd.f32 %v111_v18, %v110_v13  ;;  %v280_v38 = vld [vmem:[#allocation9 + $0x48] sm:$0xff]  ;;  %v441_v43 = vld [vmem:[#allocation9 + $0xb8] sm:$0xff]  ;;  %v440_v44 = vld [vmem:[#allocation9 + $0xb0] sm:$0xff]  ;;  %s1024_s19 = smov [#allocation12]  }
  0x38   :  { %789 = vmatpush3.msra.mxu1 %v284_v3  ;;  %v98_v25 = vadd.f32 %v97_v16, %v96_v11  ;;  %v125_v28 = vrot.slane %v124_v22, 4  ;;  %v132_v31 = vrot.slane %v131_v23, 4  ;;  %v139_v32 = vrot.slane %v138_v24, 4  ;;  %823 = vmatpush3.msra.mxu0 %v441_v43  ;;  %v279_v49 = vld [vmem:[#allocation9 + $0x40] sm:$0xff]  ;;  %v439_v54 = vld [vmem:[#allocation9 + $0xa8] sm:$0xff]  ;;  %v180_v11 = vld [vmem:[#allocation7 + $0x10] sm:$0xff] }
  0x39   :  { %790 = vmatprep.subr.mxu1 %v1022_v0  ;;  %v119_v30 = vadd.f32 %v118_v21, %v117_v19  ;;  %v145_v33 = vsel %vm83_vm0, %v94_v15, 0.0  ;;  %v106_v35 = vrot.slane %v105_v26, 2  ;;  %v113_v36 = vrot.slane %v112_v27, 2  ;;  %824 = vmatprep.subr.mxu0 %v1022_v0  ;;  %v178_v63 = vld [vmem:[#allocation7] sm:$0xff]  ;;  %v179_v1 = vld [vmem:[#allocation7 + $0x8] sm:$0xff]  ;;  %v437_v12 = vld [vmem:[#allocation9 + $0x98] sm:$0xff] }
  0x3a   :  { %791 = vmatpush3.msra.mxu1 %v283_v4  ;;  %v99_v34 = vrot.slane %v98_v25, 2  ;;  %v126_v37 = vadd.f32 %v125_v28, %v124_v22  ;;  %v133_v40 = vadd.f32 %v132_v31, %v131_v23  ;;  %v140_v41 = vadd.f32 %v139_v32, %v138_v24  ;;  %825 = vmatpush3.msra.mxu0 %v440_v44  ;;  %v438_v2 = vld [vmem:[#allocation9 + $0xa0] sm:$0xff]  ;;  %v181_v15 = vld [vmem:[#allocation7 + $0x18] sm:$0xff]  ;;  %v436_v22 = vld [vmem:[#allocation9 + $0x90] sm:$0xff]  ;;  %s713_s20 = sshll.u32 %s1024_s19, 4  ;;  %s714_s20 = int_to_ptr.vmem [resolvable:$true] %s713_s20 }
  0x3b   :  { %792 = vmatprep.subr.mxu1 %v1022_v0  ;;  %v120_v39 = vrot.slane %v119_v30, 2  ;;  %v146_v42 = vrot.slane %v145_v33, 4  ;;  %v107_v46 = vadd.f32 %v106_v35, %v105_v26  ;;  %v114_v47 = vadd.f32 %v113_v36, %v112_v27  ;;  %826 = vmatprep.subr.mxu0 %v1022_v0  ;;  %v182_v24 = vld [vmem:[#allocation7 + $0x20] sm:$0xff]  ;;  %p993_p7 = scmp.lt.s32.totalorder %s714_s20, %s714_s20 }
  0x3c   :  { %793 = vmatpush3.msra.mxu1 %v282_v20  ;;  %v100_v45 = vadd.f32 %v99_v34, %v98_v25  ;;  %v127_v48 = vrot.slane %v126_v37, 2  ;;  %v134_v51 = vrot.slane %v133_v40, 2  ;;  %v141_v52 = vrot.slane %v140_v41, 2  ;;  %827 = vmatpush3.msra.mxu0 %v439_v54  ;;  %v183_v25 = vld [vmem:[#allocation7 + $0x28] sm:$0xff]  ;;  %v86_v34 = vld [vmem:[#allocation2] sm:$0xff]  ;;  %v434_v44 = vld [vmem:[#allocation9 + $0x80] sm:$0xff] }
  0x3d   :  { %794 = vmatprep.subr.mxu1 %v1022_v0  ;;  %v121_v50 = vadd.f32 %v120_v39, %v119_v30  ;;  %v147_v53 = vadd.f32 %v146_v42, %v145_v33  ;;  %vm172_vm8 = vcmask 1047559   ;;  %v108_v56 = vrot.slane %v107_v46, 1  ;;  %828 = vmatprep.subr.mxu0 %v1022_v0  ;;  %v435_v33 = vld [vmem:[#allocation9 + $0x88] sm:$0xff] }
  0x3e   :  { %795 = vmatpush3.msra.mxu1 %v281_v29  ;;  %v101_v55 = vrot.slane %v100_v45, 1  ;;  %v115_v57 = vrot.slane %v114_v47, 1  ;;  %v128_v58 = vadd.f32 %v127_v48, %v126_v37  ;;  %v135_v60 = vadd.f32 %v134_v51, %v133_v40  ;;  %829 = vmatpush3.msra.mxu0 %v438_v2  ;;  %v184_v40 = vld [vmem:[#allocation7 + $0x30] sm:$0xff] }
  0x3f   :  { %796 = vmatprep.subr.mxu1 %v1022_v0  ;;  %v122_v59 = vrot.slane %v121_v50, 1  ;;  %v142_v61 = vadd.f32 %v141_v52, %v140_v41  ;;  %v148_v62 = vrot.slane %v147_v53, 2  ;;  %v109_v4 = vadd.f32 %v108_v56, %v107_v46  ;;  %830 = vmatprep.subr.mxu0 %v1022_v0 }
  0x40   :  { %797 = vmatpush3.msra.mxu1 %v280_v38  ;;  %v102_v3 = vadd.f32 %v101_v55, %v100_v45  ;;  %v116_v5 = vadd.f32 %v115_v57, %v114_v47  ;;  %v129_v6 = vrot.slane %v128_v58, 1  ;;  %v136_v8 = vrot.slane %v135_v60, 1  ;;  %831 = vmatpush3.msra.mxu0 %v437_v12 }
  0x41   :  { %798 = vmatprep.subr.mxu1 %v1022_v0  ;;  %v123_v7 = vadd.f32 %v122_v59, %v121_v50  ;;  %v143_v9 = vrot.slane %v142_v61, 1  ;;  %v149_v10 = vadd.f32 %v148_v62, %v147_v53  ;;  %v186_v16 = vsel %vm83_vm0, %v178_v63, 0.0  ;;  %832 = vmatprep.subr.mxu0 %v1022_v0  ;;  %v185_v50 = vld [vmem:[#allocation7 + $0x38] sm:$0xff] }
  0x42   :  { %799 = vmatpush3.msra.mxu1 %v279_v49  ;;  %v130_v13 = vadd.f32 %v129_v6, %v128_v58  ;;  %v161_v14 = vsel %vm160_vm2, %v109_v4, %v102_v3  ;;  %v193_v17 = vsel %vm83_vm0, %v179_v1, 0.0  ;;  %v137_v18 = vadd.f32 %v136_v8, %v135_v60  ;;  %833 = vmatpush3.msra.mxu0 %v436_v22 }
  0x43   :  { %803 = vmatprep.subr.mxu1 %v1022_v0  ;;  %v144_v19 = vadd.f32 %v143_v9, %v142_v61  ;;  %v150_v20 = vrot.slane %v149_v10, 1  ;;  %v163_v21 = vsel %vm162_vm3, %v116_v5, %v161_v14  ;;  %v187_v26 = vrot.slane %v186_v16, 4  ;;  %834 = vmatprep.subr.mxu0 %v1022_v0 }
  0x44   :  { %v165_v23 = vsel %vm164_vm4, %v123_v7, %v163_v21  ;;  %v194_v27 = vrot.slane %v193_v17, 4  ;;  %v200_v28 = vsel %vm83_vm0, %v180_v11, 0.0  ;;  %v207_v32 = vsel %vm83_vm0, %v181_v15, 0.0  ;;  %835 = vmatpush3.msra.mxu0 %v435_v33 }
  0x45   :  { %v151_v29 = vadd.f32 %v150_v20, %v149_v10  ;;  %v167_v30 = vsel %vm166_vm5, %v130_v13, %v165_v23  ;;  %v201_v31 = vrot.slane %v200_v28, 4  ;;  %v188_v36 = vadd.f32 %v187_v26, %v186_v16  ;;  %836 = vmatprep.subr.mxu0 %v1022_v0 }
  0x46   :  { %v169_v35 = vsel %vm168_vm6, %v137_v18, %v167_v30  ;;  %v195_v37 = vadd.f32 %v194_v27, %v193_v17  ;;  %v208_v38 = vrot.slane %v207_v32, 4  ;;  %v214_v42 = vsel %vm83_vm0, %v182_v24, 0.0  ;;  %837 = vmatpush3.msra.mxu0 %v434_v44  ;;  %v276_v44 = vld [vmem:[#allocation9 + $0x30] sm:$0xff] }
  0x47   :  { %v171_v39 = vsel %vm170_vm7, %v144_v19, %v169_v35  ;;  %v202_v41 = vadd.f32 %v201_v31, %v200_v28  ;;  %v221_v43 = vsel %vm83_vm0, %v183_v25, 0.0  ;;  %v189_v46 = vrot.slane %v188_v36, 2  ;;  %860 = vmatprep.subr.mxu0 %v1022_v0  ;;  %v177_v35 = vld [vmem:[#allocation3] sm:$0xff] }
  0x48   :  { %v173_v45 = vsel %vm172_vm8, %v151_v29, %v171_v39  ;;  %v196_v47 = vrot.slane %v195_v37, 2  ;;  %v209_v48 = vadd.f32 %v208_v38, %v207_v32  ;;  %v215_v52 = vrot.slane %v214_v42, 4 }
  0x49   :  { %v175_v49 = vadd.f32 %v173_v45, %v86_v34  ;;  %v203_v51 = vrot.slane %v202_v41, 2  ;;  %v222_v53 = vrot.slane %v221_v43, 4  ;;  %v190_v54 = vadd.f32 %v189_v46, %v188_v36  ;;  %v275_v45 = vld [vmem:[#allocation9 + $0x28] sm:$0xff]  ;;  %v274_v46 = vld [vmem:[#allocation9 + $0x20] sm:$0xff] }
  0x4a   :  { %v197_v55 = vadd.f32 %v196_v47, %v195_v37  ;;  %v210_v56 = vrot.slane %v209_v48, 2  ;;  %v228_v57 = vsel %vm83_vm0, %v184_v40, 0.0  ;;  %v216_v59 = vadd.f32 %v215_v52, %v214_v42  ;;  %v273_v47 = vld [vmem:[#allocation9 + $0x18] sm:$0xff] }
  0x4b   :  { %176 = vst.msk [vmem:[#allocation2] sm:$0xff] %vm83_vm0, %v175_v49  ;;  %v204_v58 = vadd.f32 %v203_v51, %v202_v41  ;;  %v223_v60 = vadd.f32 %v222_v53, %v221_v43  ;;  %v229_v61 = vrot.slane %v228_v57, 4  ;;  %v191_v62 = vrot.slane %v190_v54, 1  ;;  %v277_v43 = vld [vmem:[#allocation9 + $0x38] sm:$0xff]  ;;  %v271_v49 = vld [vmem:[#allocation9 + $0x8] sm:$0xff]  ;;  %v523_v53 = vld [vmem:[#allocation9 + $0xf0] sm:$0xff] }
  0x4c   :  { %v198_v63 = vrot.slane %v197_v55, 1  ;;  %v211_v1 = vadd.f32 %v210_v56, %v209_v48  ;;  %v235_v2 = vsel %vm83_vm0, %v185_v50, 0.0  ;;  %v217_v4 = vrot.slane %v216_v59, 2  ;;  %v272_v48 = vld [vmem:[#allocation9 + $0x10] sm:$0xff]  ;;  %v270_v50 = vld [vmem:[#allocation9] sm:$0xff]  ;;  %v524_v52 = vld [vmem:[#allocation9 + $0xf8] sm:$0xff] }
  0x4d   :  { %v205_v3 = vrot.slane %v204_v58, 1  ;;  %v224_v5 = vrot.slane %v223_v60, 2  ;;  %v230_v6 = vadd.f32 %v229_v61, %v228_v57  ;;  %v192_v7 = vadd.f32 %v191_v62, %v190_v54  ;;  %v522_v54 = vld [vmem:[#allocation9 + $0xe8] sm:$0xff]  ;;  %v520_v56 = vld [vmem:[#allocation9 + $0xd8] sm:$0xff]  ;;  %v519_v57 = vld [vmem:[#allocation9 + $0xd0] sm:$0xff] }
  0x4e   :  { %v199_v8 = vadd.f32 %v198_v63, %v197_v55  ;;  %v212_v9 = vrot.slane %v211_v1, 1  ;;  %v236_v10 = vrot.slane %v235_v2, 4  ;;  %v218_v12 = vadd.f32 %v217_v4, %v216_v59  ;;  %v521_v55 = vld [vmem:[#allocation9 + $0xe0] sm:$0xff]  ;;  %v627_v61 = vld [vmem:[#allocation10 + $0x70] sm:$0xff]  ;;  %v626_v62 = vld [vmem:[#allocation10 + $0x68] sm:$0xff] }
  0x4f   :  { %v206_v11 = vadd.f32 %v205_v3, %v204_v58  ;;  %v225_v13 = vadd.f32 %v224_v5, %v223_v60  ;;  %v231_v14 = vrot.slane %v230_v6, 2  ;;  %v518_v58 = vld [vmem:[#allocation9 + $0xc8] sm:$0xff]  ;;  %v517_v59 = vld [vmem:[#allocation9 + $0xc0] sm:$0xff]  ;;  %v628_v60 = vld [vmem:[#allocation10 + $0x78] sm:$0xff] }
  0x50   :  { %v213_v15 = vadd.f32 %v212_v9, %v211_v1  ;;  %v237_v16 = vadd.f32 %v236_v10, %v235_v2  ;;  %v250_v17 = vsel %vm160_vm2, %v199_v8, %v192_v7  ;;  %v219_v18 = vrot.slane %v218_v12, 1  ;;  %v625_v63 = vld [vmem:[#allocation10 + $0x60] sm:$0xff]  ;;  %v624_v1 = vld [vmem:[#allocation10 + $0x58] sm:$0xff]  ;;  %v623_v2 = vld [vmem:[#allocation10 + $0x50] sm:$0xff] }
  0x51   :  { %v226_v19 = vrot.slane %v225_v13, 1  ;;  %v232_v20 = vadd.f32 %v231_v14, %v230_v6  ;;  %v251_v21 = vsel %vm162_vm3, %v206_v11, %v250_v17  ;;  %v622_v3 = vld [vmem:[#allocation10 + $0x48] sm:$0xff]  ;;  %v621_v4 = vld [vmem:[#allocation10 + $0x40] sm:$0xff]  ;;  %v620_v5 = vld [vmem:[#allocation10 + $0x38] sm:$0xff] }
  0x52   :  { %v238_v22 = vrot.slane %v237_v16, 2  ;;  %v252_v23 = vsel %vm164_vm4, %v213_v15, %v251_v21  ;;  %v263_v24 = vld [vmem:[#allocation2] sm:$0xff]  ;;  %v220_v25 = vadd.f32 %v219_v18, %v218_v12  ;;  %v618_v7 = vld [vmem:[#allocation10 + $0x28] sm:$0xff]  ;;  %v617_v8 = vld [vmem:[#allocation10 + $0x20] sm:$0xff] }
  0x53   :  { %v227_v26 = vadd.f32 %v226_v19, %v225_v13  ;;  %v233_v27 = vrot.slane %v232_v20, 1  ;;  %v264_v28 = vmul.f32 0.125, %v263_v24  ;;  %v619_v6 = vld [vmem:[#allocation10 + $0x30] sm:$0xff]  ;;  %v616_v9 = vld [vmem:[#allocation10 + $0x18] sm:$0xff]  ;;  %v614_v11 = vld [vmem:[#allocation10 + $0x8] sm:$0xff] }
  0x54   :  { %v239_v29 = vadd.f32 %v238_v22, %v237_v16  ;;  %v253_v31 = vsel %vm166_vm5, %v220_v25, %v252_v23  ;;  %v615_v10 = vld [vmem:[#allocation10 + $0x10] sm:$0xff]  ;;  %v613_v12 = vld [vmem:[#allocation10] sm:$0xff] }
  0x55   :  { %v234_v30 = vadd.f32 %v233_v27, %v232_v20  ;;  %839 = vmatmul.mubr.msk.f32.vlgmr.msra.gmra.mxu0 %vm83_vm0, %v264_v28  ;;  %v254_v33 = vsel %vm168_vm6, %v227_v26, %v253_v31  ;;  %v728_v22 = vld [vmem:[%s1194_s3] ss:$0 sm:$0xff]  ;;  %s988_s3 = scalar_lea.vmem %s714_s20, 128 }
  0x56   :  { %v240_v32 = vrot.slane %v239_v29, 1  ;;  %892 = vmatprep.mubr.msk.f32.mxu0 %vm1023_vm1, %v1022_v0  ;;  %861 = vmatpush3.msra.mxu0 %v628_v60  ;;  %p989_p6 = scmp.ne.s32.totalorder %s714_s20, %s988_s3  ;;  %p994_p8 = scmp.lt.s32.totalorder %s988_s3, %s988_s3 }
  0x57   :  { %v255_v34 = vsel %vm170_vm7, %v234_v30, %v254_v33  ;;  %862 = vmatprep.subr.mxu0 %v1022_v0 }
  0x58   :  { %v241_v36 = vadd.f32 %v240_v32, %v239_v29  ;;  %863 = vmatpush3.msra.mxu0 %v627_v61  ;;  %v730_v29 = vld [vmem:[%s1196_s5] ss:$0 sm:$0xff]  ;;  %p995_p9 = por %p994_p8, %p993_p7 }
  0x59   :  { %864 = vmatprep.subr.mxu0 %v1022_v0 }
  0x5a   :  { %v256_v37 = vsel %vm172_vm8, %v241_v36, %v255_v34  ;;  %865 = vmatpush3.msra.mxu0 %v626_v62  ;;  %p996_p10 = pnand %p995_p9, %p989_p6 }
  0x5b   :  { %v258_v38 = vadd.f32 %v256_v37, %v177_v35  ;;  %866 = vmatprep.subr.mxu0 %v1022_v0 }
  0x5c   :  { %867 = vmatpush3.msra.mxu0 %v625_v63 }
  0x5d   :  { %259 = vst.msk [vmem:[#allocation3] sm:$0xff] %vm83_vm0, %v258_v38  ;;  %868 = vmatprep.subr.mxu0 %v1022_v0 }
  0x5e   :  { %869 = vmatpush3.msra.mxu0 %v624_v1 }
  0x5f   :  { %870 = vmatprep.subr.mxu0 %v1022_v0 }
  0x60   :  { %871 = vmatpush3.msra.mxu0 %v623_v2 }
  0x61   :  { %872 = vmatprep.subr.mxu0 %v1022_v0 }
  0x62   :  { %873 = vmatpush3.msra.mxu0 %v622_v3 }
  0x63   :  { %874 = vmatprep.subr.mxu0 %v1022_v0 }
  0x64   :  { %v265_v39 = vld [vmem:[#allocation3] sm:$0xff]  ;;  %875 = vmatpush3.msra.mxu0 %v621_v4 }
  0x65   :  { %v266_v40 = vmul.f32 0.125, %v265_v39  ;;  %876 = vmatprep.subr.mxu0 %v1022_v0 }
  0x66   :  { %877 = vmatpush3.msra.mxu0 %v620_v5 }
  0x67   :  { %v268_v41 = vsub.f32 %v264_v28, %v266_v40  ;;  %v267_v51 = vmul.f32 %v266_v40, %v264_v28  ;;  %878 = vmatprep.subr.mxu0 %v1022_v0 }
  0x68   :  { %879 = vmatpush3.msra.mxu0 %v619_v6 }
  0x69   :  { %v269_v42 = vand.u32 2147483647, %v268_v41  ;;  %880 = vmatprep.subr.mxu0 %v1022_v0 }
  0x6a   :  { %881 = vmatpush3.msra.mxu0 %v618_v7 }
  0x6b   :  { %801 = vmatmul.mubr.msk.f32.vlgmr.msra.gmra.mxu1 %vm83_vm0, %v269_v42  ;;  %882 = vmatprep.subr.mxu0 %v1022_v0 }
  0x6c   :  { %804 = vmatpush3.msra.mxu1 %v277_v43  ;;  %819 = vmatprep.mubr.msk.f32.mxu1 %vm1023_vm1, %v1022_v0 }
  0x6d   :  { %805 = vmatprep.subr.mxu1 %v1022_v0  ;;  %883 = vmatpush3.msra.mxu0 %v617_v8 }
  0x6e   :  { %806 = vmatpush3.msra.mxu1 %v276_v44  ;;  %884 = vmatprep.subr.mxu0 %v1022_v0 }
  0x6f   :  { %807 = vmatprep.subr.mxu1 %v1022_v0  ;;  %885 = vmatpush3.msra.mxu0 %v616_v9 }
  0x70   :  { %808 = vmatpush3.msra.mxu1 %v275_v45  ;;  %886 = vmatprep.subr.mxu0 %v1022_v0 }
  0x71   :  { %809 = vmatprep.subr.mxu1 %v1022_v0  ;;  %887 = vmatpush3.msra.mxu0 %v615_v10 }
  0x72   :  { %810 = vmatpush3.msra.mxu1 %v274_v46  ;;  %888 = vmatprep.subr.mxu0 %v1022_v0 }
  0x73   :  { %811 = vmatprep.subr.mxu1 %v1022_v0  ;;  %889 = vmatpush3.msra.mxu0 %v614_v11 }
  0x74   :  { %812 = vmatpush3.msra.mxu1 %v273_v47  ;;  %890 = vmatprep.subr.mxu0 %v1022_v0 }
  0x75   :  { %813 = vmatprep.subr.mxu1 %v1022_v0  ;;  %891 = vmatpush3.msra.mxu0 %v613_v12 }
  0x76   :  { %814 = vmatpush3.msra.mxu1 %v272_v48 }
  0x77   :  { %815 = vmatprep.subr.mxu1 %v1022_v0 }
  0x78   :  { %816 = vmatpush3.msra.mxu1 %v271_v49 }
  0x79   :  { %817 = vmatprep.subr.mxu1 %v1022_v0 }
  0x7a   :  { %818 = vmatpush3.msra.mxu1 %v270_v50 }
  0x7b   :  { %820 = vmatmul.mubr.msk.f32.vlgmr.msra.gmra.mxu1 %vm83_vm0, %v267_v51  ;;  %841 = vmatprep.subr.mxu1 %v1022_v0 }
  0x7c   :  { %842 = vmatpush3.msra.mxu1 %v524_v52  ;;  %857 = vmatprep.mubr.msk.f32.mxu1 %vm1023_vm1, %v1022_v0 }
  0x7d   :  { %843 = vmatprep.subr.mxu1 %v1022_v0 }
  0x7e   :  { %844 = vmatpush3.msra.mxu1 %v523_v53 }
  0x7f   :  { %845 = vmatprep.subr.mxu1 %v1022_v0 }
  0x80   :  { %846 = vmatpush3.msra.mxu1 %v522_v54 }
  0x81   :  { %847 = vmatprep.subr.mxu1 %v1022_v0 }
  0x82   :  { %848 = vmatpush3.msra.mxu1 %v521_v55 }
  0x83   :  { %849 = vmatprep.subr.mxu1 %v1022_v0 }
  0x84   :  { %850 = vmatpush3.msra.mxu1 %v520_v56 }
  0x85   :  { %851 = vmatprep.subr.mxu1 %v1022_v0 }
  0x86   :  { %852 = vmatpush3.msra.mxu1 %v519_v57 }
  0x87   :  { %853 = vmatprep.subr.mxu1 %v1022_v0 }
  0x88   :  { %854 = vmatpush3.msra.mxu1 %v518_v58 }
  0x89   :  { %855 = vmatprep.subr.mxu1 %v1022_v0 }
  0x8a   :  { %856 = vmatpush3.msra.mxu1 %v517_v59 }
  0x8b   :  { %858 = vmatmul.mubr.msk.f32.vlgmr.msra.gmra.mxu1 %vm83_vm0, %v266_v40 }
 0x115   :  { %v511_v13 = vpop.f32.mrf.mxu0 }
 0x117   :  { %v840_v14 = vpop.f32.mrf.mxu0 }
 0x12b   :  { %v356_v15 = vpop.f32.mrf.mxu1 }
 0x12d   :  { %v802_v16 = vpop.f32.mrf.mxu1 }
 0x13b   :  { %v429_v17 = vpop.f32.mrf.mxu1 }
 0x13c   :  { %v430_v19 = vadd.f32 %v429_v17, %v356_v15 }
 0x13d   :  { %v821_v18 = vpop.f32.mrf.mxu1 }
 0x13e   :  { %v515_v20 = vadd.f32 %v511_v13, %v430_v19 }
 0x14b   :  { %v594_v21 = vpop.f32.mrf.mxu1 }
 0x14c   :  { %v598_v23 = vadd.f32 %v594_v21, %v515_v20 }
 0x14d   :  { %v859_v24 = vpop.f32.mrf.mxu1 }
 0x14e   :  { %v606_v25 = vadd.f32 %v728_v22, %v598_v23 }
 0x150   :  { %v729_v26 = vmul.f32 -1.442695, %v606_v25 }
 0x152   :  { %904 = vpow2.f32 %v729_v26 }
 0x15f   :  { %v905_v0 = vpop.eup %904 }
 0x160   :  { %v610_v27 = vadd.f32 1.0, %v905_v0 }
 0x162   :  { %906 = vrcp.f32 %v610_v27 }
 0x16f   :  { %v907_v28 = vpop.eup %906 }
 0x170   :  { %893 = vmatmul.mubr.f32.vlgmr.msra.gmra.mxu0 %v907_v28 }
 0x230   :  { %v702_v30 = vpop.f32.mrf.mxu0 }
 0x231   :  { %v703_v31 = vadd.f32 %v730_v29, %v702_v30 }
 0x232   :  { %v894_v32 = vpop.f32.mrf.mxu0 }
 0x233   :  { %706 = vst [vmem:[#allocation12] sm:$0xff] %v703_v31 }
 0x234   :  { %999 = shalt.err (!%p996_p10)
}
 0x235   :  { %716 = dma.vmem_to_hbm [thread:$0]  %s714_s20, 128, %s1197_s6, [#allocation6]  }
 0x236   :  { %1014 = dma.done.wait [#allocation6], 128  }
 0x237   :  { %1015 = vsyncadd [#allocation6], 4294967168 }
 0x238   :  { %720 = vsyncpa [#allocation5], 1 }
 0x239   :  { %721 = vsyncpa [#allocation8], 1 }
 0x23a   :  { %722 = vsyncpa [#allocation11], 1 }
 0x23b   :  { %723 = vsyncpa [#allocation6], 1 }

</bundles_post_ra>
